<compile_context>
chip_gen: v7x
topology: tpu7x:2x2x1
jax: 0.10.0
libtpu: 0.0.40
codegen_flags: <defaults>
</compile_context>

<pallas_src>
import jax
import jax.numpy as jnp
from jax.experimental import pallas as pl
from jax.experimental.pallas import tpu as pltpu

C = 128       # out_channels   (original: 512)
K = 128       # kernel_size    (original: 2048)  -- lane-dense
S = K // 2    # stride         (original: 1024)
P = S - 1     # padding        (original: 1023)

TM = 128      # rows (conv windows) per grid step; raise to 256-512 (v7x) or
              # 512-1024 (v5e/v6e) at original-scale problem sizes.


def _vae_kernel(xf_ref, wenc_ref, benc_ref, wd_ref, eps_ref,
                ymean_ref, ystd_ref, dec_ref):
    xf = xf_ref[...]                                            # (TM, K) bf16
    # Fused encodermean + encoderstd: one (TM,K)@(K,2C) MXU pass, f32 acc.
    s = jnp.dot(xf, wenc_ref[...],
                preferred_element_type=jnp.float32) + benc_ref[...]
    ymean = jnp.tanh(s[:, :C])                                  # encodermean
    ystd = jnp.abs(jnp.tanh(s[:, C:]))                          # encoderstd
    # Reparameterization: Yvariational = Yencmean + Yencstd * eps   (f32 VPU)
    yvar = ymean + ystd * eps_ref[...]
    # Decoder ConvTranspose1d as per-frame (TM,C)@(C,K); overlap-add in glue.
    dec = jnp.dot(yvar.astype(wd_ref.dtype), wd_ref[...],
                  preferred_element_type=jnp.float32)
    ymean_ref[...] = ymean
    ystd_ref[...] = ystd
    dec_ref[...] = dec


def convautoenc_forward(x, params, noise_key, *, tm=TM):
    """x: (B, 1, L) float32 (NCL, like PyTorch). Returns (Ypred, Yencmean, Yencstd)."""
    wm, bm, ws, bs, wd, bd = params
    B, _, L = x.shape
    Lout = (L + 2 * P - K) // S + 1
    M = B * Lout

    # ---- glue: framing WITHOUT a gather. Since K = 2*S each window is the
    # concatenation of two consecutive S-length blocks of the padded signal.
    xp = jnp.pad(x[:, 0, :], ((0, 0), (P, P)))                  # (B, L+2P)
    blocks = xp[:, :(Lout + 1) * S].reshape(B, Lout + 1, S)
    frames = jnp.concatenate(
        [blocks[:, :Lout, :], blocks[:, 1:, :]], axis=-1).reshape(M, K)

    # torch.randn_like(Yencstd) -> deterministic JAX normal noise (f32).
    eps = jax.random.normal(noise_key, (M, C), dtype=jnp.float32)

    # Pad rows to a multiple of the tile; cropped after the kernel.
    n_tiles = pl.cdiv(M, tm)
    Mp = n_tiles * tm
    if Mp != M:
        frames = jnp.pad(frames, ((0, Mp - M), (0, 0)))
        eps = jnp.pad(eps, ((0, Mp - M), (0, 0)))

    # Fused encoder weights (K, 2C) and decoder weights (C, K); bf16 MXU inputs.
    w_enc = jnp.concatenate([wm[:, 0, :].T, ws[:, 0, :].T],
                            axis=1).astype(jnp.bfloat16)        # (K, 2C)
    b_enc = jnp.concatenate([bm, bs]).reshape(1, 2 * C).astype(jnp.float32)
    w_dec = wd[:, 0, :].astype(jnp.bfloat16)                    # (C, K)
    frames_b = frames.astype(jnp.bfloat16)

    row = lambda i: (i, 0)    # tiled over M
    pin = lambda i: (0, 0)    # VMEM-resident across the whole grid

    ymean, ystd, dec = pl.pallas_call(
        _vae_kernel,
        out_shape=(
            jax.ShapeDtypeStruct((Mp, C), jnp.float32),
            jax.ShapeDtypeStruct((Mp, C), jnp.float32),
            jax.ShapeDtypeStruct((Mp, K), jnp.float32),
        ),
        grid=(n_tiles,),
        in_specs=[
            pl.BlockSpec((tm, K), row),        # frames
            pl.BlockSpec((K, 2 * C), pin),     # fused encoder weight
            pl.BlockSpec((1, 2 * C), pin),     # fused encoder bias
            pl.BlockSpec((C, K), pin),         # decoder weight
            pl.BlockSpec((tm, C), row),        # eps
        ],
        out_specs=(
            pl.BlockSpec((tm, C), row),
            pl.BlockSpec((tm, C), row),
            pl.BlockSpec((tm, K), row),
        ),
        compiler_params=pltpu.CompilerParams(
            dimension_semantics=("parallel",),
            vmem_limit_bytes=32 * 1024 * 1024,
        ),
    )(frames_b, w_enc, b_enc, w_dec, eps)

    ymean, ystd, dec = ymean[:M], ystd[:M], dec[:M]

    # NCL layout to match the PyTorch module's outputs (pure layout plumbing;
    # drop the transposes if the consumer can take (B, Lout, C)).
    Yencmean = ymean.reshape(B, Lout, C).transpose(0, 2, 1)     # (B, C, Lout)
    Yencstd = ystd.reshape(B, Lout, C).transpose(0, 2, 1)       # (B, C, Lout)

    # ---- glue: ConvTranspose1d overlap-add WITHOUT a scatter (K = 2*S):
    # block j of the full output = first half of frame j + second half of
    # frame j-1.  Then crop the padding and add the (scalar) output bias.
    dec_frames = dec.reshape(B, Lout, K)
    zeros = jnp.zeros((B, 1, S), jnp.float32)
    full = (jnp.concatenate([dec_frames[:, :, :S], zeros], axis=1) +
            jnp.concatenate([zeros, dec_frames[:, :, S:]], axis=1)
            ).reshape(B, (Lout + 1) * S)
    L_dec = (Lout - 1) * S - 2 * P + K
    Ypred = (full[:, P:P + L_dec] + bd[0])[:, None, :]          # (B, 1, L_dec)
    return Ypred, Yencmean, Yencstd


def init_params(key):
    ks = jax.random.split(key, 6)
    lim = 1.0 / jnp.sqrt(jnp.float32(K))     # PyTorch default U(-1/sqrt(fan_in), +)
    wm = jax.random.uniform(ks[0], (C, 1, K), jnp.float32, -lim, lim)  # Conv1d
    bm = jax.random.uniform(ks[1], (C,), jnp.float32, -lim, lim)
    ws = jax.random.uniform(ks[2], (C, 1, K), jnp.float32, -lim, lim)
    bs = jax.random.uniform(ks[3], (C,), jnp.float32, -lim, lim)
    wd = jax.random.uniform(ks[4], (C, 1, K), jnp.float32, -lim, lim)  # ConvT (Cin,1,K)
    bd = jax.random.uniform(ks[5], (1,), jnp.float32, -lim, lim)
    return wm, bm, ws, bs, wd, bd


if __name__ == "__main__":
    key = jax.random.PRNGKey(0)
    pkey, xkey, nkey = jax.random.split(key, 3)
    params = init_params(pkey)

    B, L = 2, 8192                           # -> Lout = 128, M = 256, grid = (2,)
    x = jax.random.normal(xkey, (B, 1, L), jnp.float32)
    x = x / jnp.max(x)                       # mirrors `x = x / max(x)` preprocessing

    fwd = jax.jit(convautoenc_forward)
    Ypred, Yencmean, Yencstd = fwd(x, params, nkey)
    jax.block_until_ready((Ypred, Yencmean, Yencstd))

    Lout = (L + 2 * P - K) // S + 1
    L_dec = (Lout - 1) * S - 2 * P + K
    assert Yencmean.shape == (B, C, Lout)
    assert Yencstd.shape == (B, C, Lout)
    assert Ypred.shape == (B, 1, L_dec)
    assert bool(jnp.all(Yencstd >= 0.0))     # |tanh| is non-negative
    assert bool(jnp.all(jnp.isfinite(Ypred)))
    assert bool(jnp.all(jnp.abs(Yencmean) <= 1.0))
    print("KERNEL_OK")
</pallas_src>

<mosaic_0001>
module attributes {stable_mosaic.version = 11 : i64} {
  func.func @_vae_kernel(%arg0: i32, %arg1: memref<128x128xbf16, #tpu.memory_space<vmem>>, %arg2: memref<128x256xbf16, #tpu.memory_space<vmem>>, %arg3: memref<1x256xf32, #tpu.memory_space<vmem>>, %arg4: memref<128x128xbf16, #tpu.memory_space<vmem>>, %arg5: memref<128x128xf32, #tpu.memory_space<vmem>>, %arg6: memref<128x128xf32, #tpu.memory_space<vmem>>, %arg7: memref<128x128xf32, #tpu.memory_space<vmem>>, %arg8: memref<128x128xf32, #tpu.memory_space<vmem>>) attributes {dimension_semantics = [#tpu.dimension_semantics<parallel>], iteration_bounds = array<i64: 2>, scalar_prefetch = 0 : i64, scratch_operands = 0 : i64, tpu.core_type = #tpu.core_type<tc>, window_params = [{transform_indices = @transform_0, window_bounds = array<i64: 128, 128>}, {pipeline_mode = #tpu.pipeline_mode<synchronous>, transform_indices = @transform_1, window_bounds = array<i64: 128, 256>}, {pipeline_mode = #tpu.pipeline_mode<synchronous>, transform_indices = @transform_2, window_bounds = array<i64: 1, 256>}, {pipeline_mode = #tpu.pipeline_mode<synchronous>, transform_indices = @transform_3, window_bounds = array<i64: 128, 128>}, {transform_indices = @transform_4, window_bounds = array<i64: 128, 128>}, {transform_indices = @transform_5, window_bounds = array<i64: 128, 128>}, {transform_indices = @transform_6, window_bounds = array<i64: 128, 128>}, {transform_indices = @transform_7, window_bounds = array<i64: 128, 128>}]} {
    %c0 = arith.constant 0 : index
    %c0_0 = arith.constant 0 : index
    %0 = vector.load %arg1[%c0, %c0_0] : memref<128x128xbf16, #tpu.memory_space<vmem>>, vector<128x128xbf16>
    %c0_1 = arith.constant 0 : index
    %c0_2 = arith.constant 0 : index
    %1 = vector.load %arg2[%c0_1, %c0_2] : memref<128x256xbf16, #tpu.memory_space<vmem>>, vector<128x256xbf16>
    %cst = arith.constant dense<0.000000e+00> : vector<128x256xf32>
    %2 = tpu.matmul %0, %1, %cst {dimension_numbers = #tpu.dot_dimension_numbers<[1], [0], [0], [1], [0, 0, 1, 1], [], []>} : vector<128x128xbf16>, vector<128x256xbf16>, vector<128x256xf32> -> vector<128x256xf32>
    %c0_3 = arith.constant 0 : index
    %c0_4 = arith.constant 0 : index
    %3 = vector.load %arg3[%c0_3, %c0_4] : memref<1x256xf32, #tpu.memory_space<vmem>>, vector<1x256xf32>
    %4 = vector.broadcast %3 : vector<1x256xf32> to vector<128x256xf32>
    %5 = arith.addf %2, %4 : vector<128x256xf32>
    %6 = vector.extract_strided_slice %5 {offsets = [0, 0], sizes = [128, 128], strides = [1, 1]} : vector<128x256xf32> to vector<128x128xf32>
    %7 = math.tanh %6 : vector<128x128xf32>
    %8 = vector.extract_strided_slice %5 {offsets = [0, 128], sizes = [128, 128], strides = [1, 1]} : vector<128x256xf32> to vector<128x128xf32>
    %9 = math.tanh %8 : vector<128x128xf32>
    %10 = math.absf %9 : vector<128x128xf32>
    %c0_5 = arith.constant 0 : index
    %c0_6 = arith.constant 0 : index
    %11 = vector.load %arg5[%c0_5, %c0_6] : memref<128x128xf32, #tpu.memory_space<vmem>>, vector<128x128xf32>
    %12 = arith.mulf %10, %11 : vector<128x128xf32>
    %13 = arith.addf %7, %12 : vector<128x128xf32>
    %14 = arith.truncf %13 : vector<128x128xf32> to vector<128x128xbf16>
    %c0_7 = arith.constant 0 : index
    %c0_8 = arith.constant 0 : index
    %15 = vector.load %arg4[%c0_7, %c0_8] : memref<128x128xbf16, #tpu.memory_space<vmem>>, vector<128x128xbf16>
    %cst_9 = arith.constant dense<0.000000e+00> : vector<128x128xf32>
    %16 = tpu.matmul %14, %15, %cst_9 {dimension_numbers = #tpu.dot_dimension_numbers<[1], [0], [0], [1], [0, 0, 1, 1], [], []>} : vector<128x128xbf16>, vector<128x128xbf16>, vector<128x128xf32> -> vector<128x128xf32>
    %c0_10 = arith.constant 0 : index
    %c0_11 = arith.constant 0 : index
    %17 = vector.load %arg6[%c0_10, %c0_11] : memref<128x128xf32, #tpu.memory_space<vmem>>, vector<128x128xf32>
    tpu.vector_store %arg6[%c0_10, %c0_11], %7 {strides = array<i32>} : memref<128x128xf32, #tpu.memory_space<vmem>>, vector<128x128xf32>,
    %c0_12 = arith.constant 0 : index
    %c0_13 = arith.constant 0 : index
    %18 = vector.load %arg7[%c0_12, %c0_13] : memref<128x128xf32, #tpu.memory_space<vmem>>, vector<128x128xf32>
    tpu.vector_store %arg7[%c0_12, %c0_13], %10 {strides = array<i32>} : memref<128x128xf32, #tpu.memory_space<vmem>>, vector<128x128xf32>,
    %c0_14 = arith.constant 0 : index
    %c0_15 = arith.constant 0 : index
    %19 = vector.load %arg8[%c0_14, %c0_15] : memref<128x128xf32, #tpu.memory_space<vmem>>, vector<128x128xf32>
    tpu.vector_store %arg8[%c0_14, %c0_15], %16 {strides = array<i32>} : memref<128x128xf32, #tpu.memory_space<vmem>>, vector<128x128xf32>,
    return
  }
  func.func @transform_0(%arg0: i32) -> (i32, i32) {
    %c0_i32 = arith.constant 0 : i32
    %c0_i32_0 = arith.constant 0 : i32
    return %arg0, %c0_i32 : i32, i32
  }
  func.func @transform_1(%arg0: i32) -> (i32, i32) {
    %c0_i32 = arith.constant 0 : i32
    %c0_i32_0 = arith.constant 0 : i32
    %c0_i32_1 = arith.constant 0 : i32
    return %c0_i32, %c0_i32_0 : i32, i32
  }
  func.func @transform_2(%arg0: i32) -> (i32, i32) {
    %c0_i32 = arith.constant 0 : i32
    %c0_i32_0 = arith.constant 0 : i32
    %c0_i32_1 = arith.constant 0 : i32
    return %c0_i32, %c0_i32_0 : i32, i32
  }
  func.func @transform_3(%arg0: i32) -> (i32, i32) {
    %c0_i32 = arith.constant 0 : i32
    %c0_i32_0 = arith.constant 0 : i32
    %c0_i32_1 = arith.constant 0 : i32
    return %c0_i32, %c0_i32_0 : i32, i32
  }
  func.func @transform_4(%arg0: i32) -> (i32, i32) {
    %c0_i32 = arith.constant 0 : i32
    %c0_i32_0 = arith.constant 0 : i32
    return %arg0, %c0_i32 : i32, i32
  }
  func.func @transform_5(%arg0: i32) -> (i32, i32) {
    %c0_i32 = arith.constant 0 : i32
    %c0_i32_0 = arith.constant 0 : i32
    return %arg0, %c0_i32 : i32, i32
  }
  func.func @transform_6(%arg0: i32) -> (i32, i32) {
    %c0_i32 = arith.constant 0 : i32
    %c0_i32_0 = arith.constant 0 : i32
    return %arg0, %c0_i32 : i32, i32
  }
  func.func @transform_7(%arg0: i32) -> (i32, i32) {
    %c0_i32 = arith.constant 0 : i32
    %c0_i32_0 = arith.constant 0 : i32
    return %arg0, %c0_i32 : i32, i32
  }
}

</mosaic_0001>

<bundles_post_ra>
// kernel: convautoenc_forward.1
= control target key start
LH: loop header
LB: loop body
LE: loop exit
PB: predicated region body
PF: predicated region fallthrough
CT: control target
= control target key end

     0   :  { %s1325_s24 = smov 0   ;;  %s1554_s0 = inlined_call_operand.vmem [shape: bf16[256,128], index: 0, kind: input, shape index: {}]   ;;  %s1555_s1 = inlined_call_operand.vmem [shape: bf16[128,256], index: 1, kind: input, shape index: {}]   ;;  %s1556_s2 = inlined_call_operand.vmem [shape: f32[1,256], index: 2, kind: input, shape index: {}]   ;;  %s1557_s3 = inlined_call_operand.vmem [shape: bf16[128,128], index: 3, kind: input, shape index: {}]   ;;  %s1558_s4 = inlined_call_operand.vmem [shape: f32[256,128], index: 4, kind: input, shape index: {}]   ;;  %s1559_s5 = inlined_call_operand.vmem [shape: f32[256,128], index: 5, kind: output, shape index: {0}]   ;;  %s1560_s6 = inlined_call_operand.vmem [shape: f32[256,128], index: 6, kind: output, shape index: {1}]   ;;  %s1561_s7 = inlined_call_operand.vmem [shape: f32[256,128], index: 7, kind: output, shape index: {2}]  }
   0x1 LB: > { %s1066_s25 = sadd.s32 4294967295, %s1282_s24   ;;  %p1070_p0 = scmp.ge.s32.totalorder %s1282_s24, 1  ;;  %s1282_s24 = sphi %s1325_s24, %s18_s24  }
   0x2   : > { %p254_p1 = scmp.lt.s32.totalorder %s1282_s24, 3 }
   0x4   : > { %p255_p2 = pnand %p1070_p0, %p254_p1 }
   0x5   : > { %v1172_v0 = vld [vmem:[%s1555_s1 + $0x4] ss:$8 sps:$4 sm:$0xff] (!%p255_p2)   ;;  %s1071_s28 = sshll.u32 (!%p255_p2), %s1066_s25, 4  ;;  %v1174_v1 = vld [vmem:[%s1555_s1] ss:$8 sps:$4 sm:$0xff] (!%p255_p2)   ;;  %v1284_v2 = vmov (!%p255_p2), 0   ;;  %v366_v33 = vlaneseq (!%p255_p2) }
   0x6   : > { %258 = sbr.rel (%p255_p2) target bundleno = 546 (0x222), region = 40  ;;  %536 = vmatprep.mubr.bf16.mxu0 (!%p255_p2), %v1284_v2  ;;  %p302_p3 = scmp.lt.s32.totalorder (!%p255_p2), %s1071_s28, 31  ;;  %504 = vmatprep.subr.bf16.mxu0 (!%p255_p2), %v1172_v0  ;;  %v1175_v3 = vld [vmem:[%s1555_s1 + $0x14] ss:$8 sps:$4 sm:$0xff] (!%p255_p2)   ;;  %v1177_v4 = vld [vmem:[%s1555_s1 + $0x10] ss:$8 sps:$4 sm:$0xff] (!%p255_p2)  }
   0x7   : > { %505 = vmatpush1.bf16.msra.mxu0 (!%p255_p2), %v1174_v1  ;;  %v1178_v5 = vld [vmem:[%s1555_s1 + $0x24] ss:$8 sps:$4 sm:$0xff] (!%p255_p2)   ;;  %v1180_v6 = vld [vmem:[%s1555_s1 + $0x20] ss:$8 sps:$4 sm:$0xff] (!%p255_p2)   ;;  %v1181_v7 = vld [vmem:[%s1555_s1 + $0x34] ss:$8 sps:$4 sm:$0xff] (!%p255_p2)  }
   0x8   : > { %506 = vmatprep.subr.bf16.mxu0 (!%p255_p2), %v1175_v3  ;;  %v1183_v8 = vld [vmem:[%s1555_s1 + $0x30] ss:$8 sps:$4 sm:$0xff] (!%p255_p2)   ;;  %v1184_v9 = vld [vmem:[%s1555_s1 + $0x44] ss:$8 sps:$4 sm:$0xff] (!%p255_p2)   ;;  %v1186_v10 = vld [vmem:[%s1555_s1 + $0x40] ss:$8 sps:$4 sm:$0xff] (!%p255_p2)  }
   0x9   : > { %v1187_v11 = vld [vmem:[%s1555_s1 + $0x54] ss:$8 sps:$4 sm:$0xff] (!%p255_p2)   ;;  %v1189_v12 = vld [vmem:[%s1555_s1 + $0x50] ss:$8 sps:$4 sm:$0xff] (!%p255_p2)   ;;  %v1190_v13 = vld [vmem:[%s1555_s1 + $0x64] ss:$8 sps:$4 sm:$0xff] (!%p255_p2)  }
   0xa   : > { %v1192_v14 = vld [vmem:[%s1555_s1 + $0x60] ss:$8 sps:$4 sm:$0xff] (!%p255_p2)   ;;  %v1193_v15 = vld [vmem:[%s1555_s1 + $0x74] ss:$8 sps:$4 sm:$0xff] (!%p255_p2)   ;;  %v1195_v16 = vld [vmem:[%s1555_s1 + $0x70] ss:$8 sps:$4 sm:$0xff] (!%p255_p2)  }
   0xb   : > { %507 = vmatpush1.bf16.msra.mxu0 (!%p255_p2), %v1177_v4  ;;  %v1204_v25 = vld [vmem:[%s1557_s3] sm:$0xff] (!%p255_p2)   ;;  %v1205_v26 = vld [vmem:[%s1557_s3 + $0x8] sm:$0xff] (!%p255_p2)   ;;  %v1206_v27 = vld [vmem:[%s1557_s3 + $0x10] sm:$0xff] (!%p255_p2)   ;;  %v367_v34 = vshrl.u32 (!%p255_p2), %v366_v33, 7 }
   0xc   : > { %508 = vmatprep.subr.bf16.mxu0 (!%p255_p2), %v1178_v5  ;;  %1131 = vmatprep.subr.bf16.mxu1 (!%p255_p2), %v1204_v25  ;;  %v1207_v28 = vld [vmem:[%s1557_s3 + $0x18] sm:$0xff] (!%p255_p2)   ;;  %v1208_v29 = vld [vmem:[%s1557_s3 + $0x20] sm:$0xff] (!%p255_p2)   ;;  %v1209_v30 = vld [vmem:[%s1557_s3 + $0x28] sm:$0xff] (!%p255_p2)  }
   0xd   : > { %s1563_s28 = smov (!%p302_p3, %s1071_s28), 31  ;;  %1132 = vmatpush3.bf16.msra.mxu1 %v1204_v25  ;;  %v1210_v31 = vld [vmem:[%s1557_s3 + $0x30] sm:$0xff]   ;;  %v1211_v32 = vld [vmem:[%s1557_s3 + $0x38] sm:$0xff]   ;;  %v368_v35 = vsub.s32 0, %v367_v34  ;;  %v364_v36 = vld [vmem:[%s1556_s2] sm:$0x3] }
   0xe   : > { %s1072_s14 = sshll.u32 %s1563_s28, 2  ;;  %1133 = vmatprep.subr.bf16.mxu1 %v1205_v26  ;;  %v372_v37 = vsub.s32 1, %v367_v34  ;;  %s1433_s16 = sshll.u32 %s1563_s28, 3 }
   0xf   : > { %s1360_s21 = scalar_lea.vmem %s1554_s0, %s1072_s14  ;;  %509 = vmatpush1.bf16.msra.mxu0 %v1180_v6  ;;  %v1424_v38 = vrot.slane %v364_v36, %v368_v35  ;;  %s1441_s19 = scalar_lea.vmem %s1559_s5, %s1433_s16 }
  0x10   : > { %510 = vmatprep.subr.bf16.mxu0 %v1181_v7  ;;  %v1196_v17 = vld [vmem:[%s1360_s21] sm:$0xff]   ;;  %v1197_v18 = vld [vmem:[%s1360_s21 + $0x8] sm:$0xff]   ;;  %v1198_v19 = vld [vmem:[%s1360_s21 + $0x10] sm:$0xff]   ;;  %v1426_v39 = vrot.slane %v364_v36, %v372_v37  ;;  %s1447_s22 = scalar_lea.vmem %s1558_s4, %s1433_s16  ;;  %s1456_s26 = scalar_lea.vmem %s1560_s6, %s1433_s16 }
  0x11   : > { %v1199_v20 = vld [vmem:[%s1360_s21 + $0x18] sm:$0xff]   ;;  %v1200_v21 = vld [vmem:[%s1360_s21 + $0x20] sm:$0xff]   ;;  %v1201_v22 = vld [vmem:[%s1360_s21 + $0x28] sm:$0xff]   ;;  %1134 = vmatpush3.bf16.msra.mxu1 %v1205_v26  ;;  %s1533_s29 = scalar_lea.vmem %s1561_s7, %s1433_s16 }
  0x12   : > { %v1202_v23 = vld [vmem:[%s1360_s21 + $0x30] sm:$0xff]   ;;  %v1203_v24 = vld [vmem:[%s1360_s21 + $0x38] sm:$0xff]   ;;  %1135 = vmatprep.subr.bf16.mxu1 %v1206_v27  ;;  %v665_v58 = vld [vmem:[%s1447_s22] sm:$0xff] }
  0x13   : > { %511 = vmatpush1.bf16.msra.mxu0 %v1183_v8  ;;  %v666_v63 = vld [vmem:[%s1447_s22 + $0x8] sm:$0xff]  ;;  %v669_v35 = vld [vmem:[%s1447_s22 + $0x20] sm:$0xff] }
  0x14   : > { %512 = vmatprep.subr.bf16.mxu0 %v1184_v9 }
  0x15   : > { %1136 = vmatpush3.bf16.msra.mxu1 %v1206_v27 }
  0x16   : > { %1137 = vmatprep.subr.bf16.mxu1 %v1207_v28 }
  0x17   : > { %513 = vmatpush1.bf16.msra.mxu0 %v1186_v10 }
  0x18   : > { %514 = vmatprep.subr.bf16.mxu0 %v1187_v11 }
  0x19   : > { %1138 = vmatpush3.bf16.msra.mxu1 %v1207_v28 }
  0x1a   : > { %1139 = vmatprep.subr.bf16.mxu1 %v1208_v29 }
  0x1b   : > { %515 = vmatpush1.bf16.msra.mxu0 %v1189_v12 }
  0x1c   : > { %516 = vmatprep.subr.bf16.mxu0 %v1190_v13 }
  0x1d   : > { %1140 = vmatpush3.bf16.msra.mxu1 %v1208_v29 }
  0x1e   : > { %1141 = vmatprep.subr.bf16.mxu1 %v1209_v30 }
  0x1f   : > { %517 = vmatpush1.bf16.msra.mxu0 %v1192_v14  ;;  %v667_v14 = vld [vmem:[%s1447_s22 + $0x10] sm:$0xff] }
  0x20   : > { %518 = vmatprep.subr.bf16.mxu0 %v1193_v15 }
  0x21   : > { %1142 = vmatpush3.bf16.msra.mxu1 %v1209_v30 }
  0x22   : > { %1143 = vmatprep.subr.bf16.mxu1 %v1210_v31 }
  0x23   : > { %519 = vmatpush1.bf16.msra.mxu0 %v1195_v16 }
  0x25   : > { %1144 = vmatpush3.bf16.msra.mxu1 %v1210_v31 }
  0x26   : > { %537 = vmatmul.mubr.bf16.vlgmr.msra.gmra.mrb[0].mxu0 %v1196_v17  ;;  %1145 = vmatprep.subr.bf16.mxu1 %v1211_v32 }
  0x27   : > { %546 = vmatprep.mubr.bf16.mxu0 %v1284_v2 }
  0x29   : > { %1146 = vmatpush3.bf16.msra.mxu1 %v1211_v32 }
  0x2e   : > { %547 = vmatmul.mubr.bf16.gmra.mrb[4].mxu0 %v1197_v18 }
  0x2f   : > { %556 = vmatprep.mubr.bf16.mxu0 %v1284_v2 }
  0x36   : > { %557 = vmatmul.mubr.bf16.gmra.mrb[8].mxu0 %v1198_v19  ;;  %v668_v19 = vld [vmem:[%s1447_s22 + $0x18] sm:$0xff] }
  0x37   : > { %566 = vmatprep.mubr.bf16.mxu0 %v1284_v2 }
  0x3e   : > { %567 = vmatmul.mubr.bf16.gmra.mrb[12].mxu0 %v1199_v20 }
  0x3f   : > { %576 = vmatprep.mubr.bf16.mxu0 %v1284_v2 }
  0x46   : > { %577 = vmatmul.mubr.bf16.gmra.mrb[16].mxu0 %v1200_v21 }
  0x47   : > { %586 = vmatprep.mubr.bf16.mxu0 %v1284_v2 }
  0x4e   : > { %587 = vmatmul.mubr.bf16.gmra.mrb[20].mxu0 %v1201_v22 }
  0x4f   : > { %596 = vmatprep.mubr.bf16.mxu0 %v1284_v2 }
  0x56   : > { %597 = vmatmul.mubr.bf16.gmra.mrb[24].mxu0 %v1202_v23 }
  0x57   : > { %606 = vmatprep.mubr.bf16.mxu0 %v1284_v2 }
  0x5e   : > { %607 = vmatmul.mubr.bf16.gmra.mrb[28].mxu0 %v1203_v24 }
  0xf9   : > { %v538_v40 = vpop.f32.mrb[0].mxu0 }
  0xfa   : > { %v539_v41 = vadd.f32 %v538_v40, %v1424_v38  ;;  %v540_v42 = vpop.f32.mrb[1].mxu0 }
  0xfb   : > { %v541_v43 = vadd.f32 %v540_v42, %v1426_v39  ;;  %v542_v44 = vpop.f32.mrb[2].mxu0  ;;  %v670_v42 = vld [vmem:[%s1447_s22 + $0x28] sm:$0xff] }
  0xfc   : > { %1212 = vtanh.f32 %v539_v41  ;;  %v543_v45 = vadd.f32 %v542_v44, %v1424_v38  ;;  %v544_v46 = vpop.f32.mrb[3].mxu0 }
  0xfd   : > { %1214 = vtanh.f32 %v541_v43  ;;  %v545_v47 = vadd.f32 %v544_v46, %v1426_v39 }
  0xfe   : > { %1216 = vtanh.f32 %v543_v45 }
  0xff   : > { %1218 = vtanh.f32 %v545_v47 }
 0x101   : > { %v548_v48 = vpop.f32.mrb[4].mxu0 }
 0x102   : > { %v549_v49 = vadd.f32 %v548_v48, %v1424_v38  ;;  %v550_v50 = vpop.f32.mrb[5].mxu0 }
 0x103   : > { %v551_v51 = vadd.f32 %v550_v50, %v1426_v39  ;;  %v552_v52 = vpop.f32.mrb[6].mxu0 }
 0x104   : > { %1220 = vtanh.f32 %v549_v49  ;;  %v553_v53 = vadd.f32 %v552_v52, %v1424_v38  ;;  %v554_v54 = vpop.f32.mrb[7].mxu0 }
 0x105   : > { %1222 = vtanh.f32 %v551_v51  ;;  %v555_v55 = vadd.f32 %v554_v54, %v1426_v39 }
 0x106   : > { %v1213_v56 = vpop.eup %1212  ;;  %1224 = vtanh.f32 %v553_v53 }
 0x107   : > { %v1215_v57 = vpop.eup %1214  ;;  %882 = vst [vmem:[%s1441_s19] sm:$0xff] %v1213_v56  ;;  %1226 = vtanh.f32 %v555_v55 }
 0x108   : > { %v1217_v59 = vpop.eup %1216  ;;  %v649_v60 = vand.u32 2147483647, %v1215_v57 }
 0x109   : > { %v1219_v61 = vpop.eup %1218  ;;  %883 = vst [vmem:[%s1441_s19 + $0x8] sm:$0xff] %v1217_v59  ;;  %v558_v62 = vpop.f32.mrb[8].mxu0 }
 0x10a   : > { %898 = vst [vmem:[%s1456_s26] sm:$0xff] %v649_v60  ;;  %v650_v0 = vand.u32 2147483647, %v1219_v61  ;;  %v559_v1 = vadd.f32 %v558_v62, %v1424_v38  ;;  %v560_v2 = vpop.f32.mrb[9].mxu0  ;;  %v681_v3 = vmul.f32 %v665_v58, %v649_v60  ;;  %v671_v58 = vld [vmem:[%s1447_s22 + $0x30] sm:$0xff] }
 0x10b   : > { %v561_v4 = vadd.f32 %v560_v2, %v1426_v39  ;;  %v562_v5 = vpop.f32.mrb[10].mxu0 }
 0x10c   : > { %899 = vst [vmem:[%s1456_s26 + $0x8] sm:$0xff] %v650_v0  ;;  %1228 = vtanh.f32 %v559_v1  ;;  %v563_v6 = vadd.f32 %v562_v5, %v1424_v38  ;;  %v564_v7 = vpop.f32.mrb[11].mxu0  ;;  %v682_v8 = vmul.f32 %v666_v63, %v650_v0  ;;  %v697_v9 = vadd.f32 %v1213_v56, %v681_v3  ;;  %v672_v63 = vld [vmem:[%s1447_s22 + $0x38] sm:$0xff] }
 0x10d   : > { %1230 = vtanh.f32 %v561_v4  ;;  %v565_v10 = vadd.f32 %v564_v7, %v1426_v39 }
 0x10e   : > { %v1221_v11 = vpop.eup %1220  ;;  %1232 = vtanh.f32 %v563_v6  ;;  %v698_v12 = vadd.f32 %v1217_v59, %v682_v8 }
 0x10f   : > { %v1223_v13 = vpop.eup %1222  ;;  %884 = vst [vmem:[%s1441_s19 + $0x10] sm:$0xff] %v1221_v11  ;;  %1234 = vtanh.f32 %v565_v10 }
 0x110   : > { %v1225_v15 = vpop.eup %1224  ;;  %v651_v16 = vand.u32 2147483647, %v1223_v13  ;;  %v713_v17 = vpack.c.bf16 %v698_v12, %v697_v9 }
 0x111   : > { %v1227_v18 = vpop.eup %1226  ;;  %885 = vst [vmem:[%s1441_s19 + $0x18] sm:$0xff] %v1225_v15  ;;  %v568_v20 = vpop.f32.mrb[12].mxu0 }
 0x112   : > { %v683_v21 = vmul.f32 %v667_v14, %v651_v16  ;;  %900 = vst [vmem:[%s1456_s26 + $0x10] sm:$0xff] %v651_v16  ;;  %v652_v22 = vand.u32 2147483647, %v1227_v18  ;;  %v569_v23 = vadd.f32 %v568_v20, %v1424_v38  ;;  %v570_v24 = vpop.f32.mrb[13].mxu0  ;;  %1147 = vmatprep.mubr.bf16.mxu1 %v713_v17  ;;  %v674_v20 = vld [vmem:[%s1447_s22 + $0x48] sm:$0xff] }
 0x113   : > { %v571_v25 = vadd.f32 %v570_v24, %v1426_v39  ;;  %v572_v26 = vpop.f32.mrb[14].mxu0 }
 0x114   : > { %v684_v27 = vmul.f32 %v668_v19, %v652_v22  ;;  %901 = vst [vmem:[%s1456_s26 + $0x18] sm:$0xff] %v652_v22  ;;  %1236 = vtanh.f32 %v569_v23  ;;  %v573_v28 = vadd.f32 %v572_v26, %v1424_v38  ;;  %v574_v29 = vpop.f32.mrb[15].mxu0  ;;  %v699_v30 = vadd.f32 %v1221_v11, %v683_v21 }
 0x115   : > { %1238 = vtanh.f32 %v571_v25  ;;  %v575_v31 = vadd.f32 %v574_v29, %v1426_v39 }
 0x116   : > { %v1229_v32 = vpop.eup %1228  ;;  %1240 = vtanh.f32 %v573_v28  ;;  %v700_v33 = vadd.f32 %v1225_v15, %v684_v27  ;;  %v673_v15 = vld [vmem:[%s1447_s22 + $0x40] sm:$0xff] }
 0x117   : > { %v1231_v34 = vpop.eup %1230  ;;  %886 = vst [vmem:[%s1441_s19 + $0x20] sm:$0xff] %v1229_v32  ;;  %1242 = vtanh.f32 %v575_v31 }
 0x118   : > { %v1233_v36 = vpop.eup %1232  ;;  %v653_v37 = vand.u32 2147483647, %v1231_v34  ;;  %v714_v40 = vpack.c.bf16 %v700_v33, %v699_v30 }
 0x119   : > { %v1235_v41 = vpop.eup %1234  ;;  %887 = vst [vmem:[%s1441_s19 + $0x28] sm:$0xff] %v1233_v36  ;;  %v578_v43 = vpop.f32.mrb[16].mxu0 }
 0x11a   : > { %v685_v44 = vmul.f32 %v669_v35, %v653_v37  ;;  %902 = vst [vmem:[%s1456_s26 + $0x20] sm:$0xff] %v653_v37  ;;  %v654_v45 = vand.u32 2147483647, %v1235_v41  ;;  %v579_v46 = vadd.f32 %v578_v43, %v1424_v38  ;;  %v580_v47 = vpop.f32.mrb[17].mxu0  ;;  %1148 = vmatmul.mubr.bf16.vlgmr.msra.gmra.mrb[0].mxu1 %v714_v40  ;;  %v676_v43 = vld [vmem:[%s1447_s22 + $0x58] sm:$0xff] }
 0x11b   : > { %v581_v48 = vadd.f32 %v580_v47, %v1426_v39  ;;  %v582_v49 = vpop.f32.mrb[18].mxu0 }
 0x11c   : > { %v686_v50 = vmul.f32 %v670_v42, %v654_v45  ;;  %903 = vst [vmem:[%s1456_s26 + $0x28] sm:$0xff] %v654_v45  ;;  %1244 = vtanh.f32 %v579_v46  ;;  %v583_v51 = vadd.f32 %v582_v49, %v1424_v38  ;;  %v584_v52 = vpop.f32.mrb[19].mxu0  ;;  %v701_v53 = vadd.f32 %v1229_v32, %v685_v44 }
 0x11d   : > { %1246 = vtanh.f32 %v581_v48  ;;  %v585_v54 = vadd.f32 %v584_v52, %v1426_v39 }
 0x11e   : > { %v1237_v55 = vpop.eup %1236  ;;  %1248 = vtanh.f32 %v583_v51  ;;  %v702_v56 = vadd.f32 %v1233_v36, %v686_v50  ;;  %v675_v36 = vld [vmem:[%s1447_s22 + $0x50] sm:$0xff] }
 0x11f   : > { %v1239_v57 = vpop.eup %1238  ;;  %888 = vst [vmem:[%s1441_s19 + $0x30] sm:$0xff] %v1237_v55  ;;  %1250 = vtanh.f32 %v585_v54 }
 0x120   : > { %v1241_v59 = vpop.eup %1240  ;;  %v655_v60 = vand.u32 2147483647, %v1239_v57  ;;  %v715_v61 = vpack.c.bf16 %v702_v56, %v701_v53 }
 0x121   : > { %v1243_v62 = vpop.eup %1242  ;;  %889 = vst [vmem:[%s1441_s19 + $0x38] sm:$0xff] %v1241_v59  ;;  %v588_v0 = vpop.f32.mrb[20].mxu0 }
 0x122   : > { %v687_v1 = vmul.f32 %v671_v58, %v655_v60  ;;  %904 = vst [vmem:[%s1456_s26 + $0x30] sm:$0xff] %v655_v60  ;;  %v656_v2 = vand.u32 2147483647, %v1243_v62  ;;  %v589_v3 = vadd.f32 %v588_v0, %v1424_v38  ;;  %v590_v4 = vpop.f32.mrb[21].mxu0  ;;  %1151 = vmatprep.mubr.bf16.mxu1 %v715_v61 }
 0x123   : > { %v591_v5 = vadd.f32 %v590_v4, %v1426_v39  ;;  %v592_v6 = vpop.f32.mrb[22].mxu0 }
 0x124   : > { %v688_v7 = vmul.f32 %v672_v63, %v656_v2  ;;  %905 = vst [vmem:[%s1456_s26 + $0x38] sm:$0xff] %v656_v2  ;;  %1252 = vtanh.f32 %v589_v3  ;;  %v593_v8 = vadd.f32 %v592_v6, %v1424_v38  ;;  %v594_v9 = vpop.f32.mrb[23].mxu0  ;;  %v703_v10 = vadd.f32 %v1237_v55, %v687_v1  ;;  %v678_v63 = vld [vmem:[%s1447_s22 + $0x68] sm:$0xff]  ;;  %v679_v6 = vld [vmem:[%s1447_s22 + $0x70] sm:$0xff] }
 0x125   : > { %1254 = vtanh.f32 %v591_v5  ;;  %v595_v11 = vadd.f32 %v594_v9, %v1426_v39 }
 0x126   : > { %v1245_v12 = vpop.eup %1244  ;;  %1256 = vtanh.f32 %v593_v8  ;;  %v704_v13 = vadd.f32 %v1241_v59, %v688_v7  ;;  %v677_v59 = vld [vmem:[%s1447_s22 + $0x60] sm:$0xff] }
 0x127   : > { %v1247_v14 = vpop.eup %1246  ;;  %890 = vst [vmem:[%s1441_s19 + $0x40] sm:$0xff] %v1245_v12  ;;  %1258 = vtanh.f32 %v595_v11  ;;  %v680_v11 = vld [vmem:[%s1447_s22 + $0x78] sm:$0xff] }
 0x128   : > { %v1249_v16 = vpop.eup %1248  ;;  %v657_v17 = vand.u32 2147483647, %v1247_v14  ;;  %v716_v18 = vpack.c.bf16 %v704_v13, %v703_v10 }
 0x129   : > { %v1251_v19 = vpop.eup %1250  ;;  %891 = vst [vmem:[%s1441_s19 + $0x48] sm:$0xff] %v1249_v16  ;;  %v598_v21 = vpop.f32.mrb[24].mxu0 }
 0x12a   : > { %v689_v22 = vmul.f32 %v673_v15, %v657_v17  ;;  %906 = vst [vmem:[%s1456_s26 + $0x40] sm:$0xff] %v657_v17  ;;  %v658_v23 = vand.u32 2147483647, %v1251_v19  ;;  %v599_v24 = vadd.f32 %v598_v21, %v1424_v38  ;;  %v600_v25 = vpop.f32.mrb[25].mxu0  ;;  %1152 = vmatmul.mubr.bf16.gmra.mrb[4].mxu1 %v716_v18 }
 0x12b   : > { %v601_v26 = vadd.f32 %v600_v25, %v1426_v39  ;;  %v602_v27 = vpop.f32.mrb[26].mxu0 }
 0x12c   : > { %v690_v28 = vmul.f32 %v674_v20, %v658_v23  ;;  %907 = vst [vmem:[%s1456_s26 + $0x48] sm:$0xff] %v658_v23  ;;  %1260 = vtanh.f32 %v599_v24  ;;  %v603_v29 = vadd.f32 %v602_v27, %v1424_v38  ;;  %v604_v30 = vpop.f32.mrb[27].mxu0  ;;  %v705_v31 = vadd.f32 %v1245_v12, %v689_v22 }
 0x12d   : > { %1262 = vtanh.f32 %v601_v26  ;;  %v605_v32 = vadd.f32 %v604_v30, %v1426_v39 }
 0x12e   : > { %v1253_v33 = vpop.eup %1252  ;;  %1264 = vtanh.f32 %v603_v29  ;;  %v706_v34 = vadd.f32 %v1249_v16, %v690_v28 }
 0x12f   : > { %v1255_v35 = vpop.eup %1254  ;;  %892 = vst [vmem:[%s1441_s19 + $0x50] sm:$0xff] %v1253_v33  ;;  %1266 = vtanh.f32 %v605_v32 }
 0x130   : > { %v1257_v37 = vpop.eup %1256  ;;  %v659_v40 = vand.u32 2147483647, %v1255_v35  ;;  %v717_v41 = vpack.c.bf16 %v706_v34, %v705_v31 }
 0x131   : > { %v1259_v42 = vpop.eup %1258  ;;  %893 = vst [vmem:[%s1441_s19 + $0x58] sm:$0xff] %v1257_v37  ;;  %v608_v44 = vpop.f32.mrb[28].mxu0 }
 0x132   : > { %v691_v45 = vmul.f32 %v675_v36, %v659_v40  ;;  %908 = vst [vmem:[%s1456_s26 + $0x50] sm:$0xff] %v659_v40  ;;  %v660_v46 = vand.u32 2147483647, %v1259_v42  ;;  %v609_v47 = vadd.f32 %v608_v44, %v1424_v38  ;;  %v610_v48 = vpop.f32.mrb[29].mxu0  ;;  %1155 = vmatprep.mubr.bf16.mxu1 %v717_v41 }
 0x133   : > { %v611_v49 = vadd.f32 %v610_v48, %v1426_v39  ;;  %v612_v50 = vpop.f32.mrb[30].mxu0 }
 0x134   : > { %v692_v51 = vmul.f32 %v676_v43, %v660_v46  ;;  %909 = vst [vmem:[%s1456_s26 + $0x58] sm:$0xff] %v660_v46  ;;  %1268 = vtanh.f32 %v609_v47  ;;  %v613_v52 = vadd.f32 %v612_v50, %v1424_v38  ;;  %v614_v53 = vpop.f32.mrb[31].mxu0  ;;  %v707_v54 = vadd.f32 %v1253_v33, %v691_v45 }
 0x135   : > { %1270 = vtanh.f32 %v611_v49  ;;  %v615_v55 = vadd.f32 %v614_v53, %v1426_v39 }
 0x136   : > { %v1261_v56 = vpop.eup %1260  ;;  %1272 = vtanh.f32 %v613_v52  ;;  %v708_v57 = vadd.f32 %v1257_v37, %v692_v51 }
 0x137   : > { %v1263_v58 = vpop.eup %1262  ;;  %894 = vst [vmem:[%s1441_s19 + $0x60] sm:$0xff] %v1261_v56  ;;  %1274 = vtanh.f32 %v615_v55 }
 0x138   : > { %v1265_v60 = vpop.eup %1264  ;;  %v661_v61 = vand.u32 2147483647, %v1263_v58  ;;  %v718_v38 = vpack.c.bf16 %v708_v57, %v707_v54 }
 0x139   : > { %v1267_v62 = vpop.eup %1266  ;;  %895 = vst [vmem:[%s1441_s19 + $0x68] sm:$0xff] %v1265_v60 }
 0x13a   : > { %v693_v0 = vmul.f32 %v677_v59, %v661_v61  ;;  %910 = vst [vmem:[%s1456_s26 + $0x60] sm:$0xff] %v661_v61  ;;  %v662_v39 = vand.u32 2147483647, %v1267_v62  ;;  %1156 = vmatmul.mubr.bf16.gmra.mrb[8].mxu1 %v718_v38 }
 0x13c   : > { %v694_v1 = vmul.f32 %v678_v63, %v662_v39  ;;  %911 = vst [vmem:[%s1456_s26 + $0x68] sm:$0xff] %v662_v39  ;;  %v709_v2 = vadd.f32 %v1261_v56, %v693_v0 }
 0x13e   : > { %v1269_v3 = vpop.eup %1268  ;;  %v710_v4 = vadd.f32 %v1265_v60, %v694_v1 }
 0x13f   : > { %v1271_v5 = vpop.eup %1270  ;;  %896 = vst [vmem:[%s1441_s19 + $0x70] sm:$0xff] %v1269_v3 }
 0x140   : > { %v1273_v7 = vpop.eup %1272  ;;  %v663_v8 = vand.u32 2147483647, %v1271_v5  ;;  %v719_v9 = vpack.c.bf16 %v710_v4, %v709_v2 }
 0x141   : > { %v1275_v10 = vpop.eup %1274  ;;  %897 = vst [vmem:[%s1441_s19 + $0x78] sm:$0xff] %v1273_v7 }
 0x142   : > { %v695_v12 = vmul.f32 %v679_v6, %v663_v8  ;;  %912 = vst [vmem:[%s1456_s26 + $0x70] sm:$0xff] %v663_v8  ;;  %v664_v13 = vand.u32 2147483647, %v1275_v10  ;;  %1159 = vmatprep.mubr.bf16.mxu1 %v719_v9 }
 0x144   : > { %v696_v14 = vmul.f32 %v680_v11, %v664_v13  ;;  %913 = vst [vmem:[%s1456_s26 + $0x78] sm:$0xff] %v664_v13  ;;  %v711_v15 = vadd.f32 %v1269_v3, %v695_v12 }
 0x146   : > { %v712_v16 = vadd.f32 %v1273_v7, %v696_v14 }
 0x148   : > { %v720_v17 = vpack.c.bf16 %v712_v16, %v711_v15 }
 0x14a   : > { %1160 = vmatmul.mubr.bf16.gmra.mrb[12].mxu1 %v720_v17 }
 0x1ed   : > { %v1149_v18 = vpop.f32.mrb[0].mxu1 }
 0x1ee   : > { %916 = vst [vmem:[%s1533_s29 + $0x10] sm:$0xff] %v1149_v18  ;;  %v819_v19 = vpop.f32.mrb[1].mxu1 }
 0x1ef   : > { %914 = vst [vmem:[%s1533_s29] sm:$0xff] %v819_v19  ;;  %v1150_v20 = vpop.f32.mrb[2].mxu1 }
 0x1f0   : > { %917 = vst [vmem:[%s1533_s29 + $0x18] sm:$0xff] %v1150_v20  ;;  %v822_v21 = vpop.f32.mrb[3].mxu1 }
 0x1f1   : > { %915 = vst [vmem:[%s1533_s29 + $0x8] sm:$0xff] %v822_v21 }
 0x1fd   : > { %v1153_v22 = vpop.f32.mrb[4].mxu1 }
 0x1fe   : > { %920 = vst [vmem:[%s1533_s29 + $0x30] sm:$0xff] %v1153_v22  ;;  %v835_v23 = vpop.f32.mrb[5].mxu1 }
 0x1ff   : > { %918 = vst [vmem:[%s1533_s29 + $0x20] sm:$0xff] %v835_v23  ;;  %v1154_v24 = vpop.f32.mrb[6].mxu1 }
 0x200   : > { %921 = vst [vmem:[%s1533_s29 + $0x38] sm:$0xff] %v1154_v24  ;;  %v838_v25 = vpop.f32.mrb[7].mxu1 }
 0x201   : > { %919 = vst [vmem:[%s1533_s29 + $0x28] sm:$0xff] %v838_v25 }
 0x20d   : > { %v1157_v26 = vpop.f32.mrb[8].mxu1 }
 0x20e   : > { %924 = vst [vmem:[%s1533_s29 + $0x50] sm:$0xff] %v1157_v26  ;;  %v851_v27 = vpop.f32.mrb[9].mxu1 }
 0x20f   : > { %922 = vst [vmem:[%s1533_s29 + $0x40] sm:$0xff] %v851_v27  ;;  %v1158_v28 = vpop.f32.mrb[10].mxu1 }
 0x210   : > { %925 = vst [vmem:[%s1533_s29 + $0x58] sm:$0xff] %v1158_v28  ;;  %v854_v29 = vpop.f32.mrb[11].mxu1 }
 0x211   : > { %923 = vst [vmem:[%s1533_s29 + $0x48] sm:$0xff] %v854_v29 }
 0x21d   : > { %v1161_v30 = vpop.f32.mrb[12].mxu1 }
 0x21e   : > { %928 = vst [vmem:[%s1533_s29 + $0x70] sm:$0xff] %v1161_v30  ;;  %v867_v31 = vpop.f32.mrb[13].mxu1 }
 0x21f   : > { %926 = vst [vmem:[%s1533_s29 + $0x60] sm:$0xff] %v867_v31  ;;  %v1162_v32 = vpop.f32.mrb[14].mxu1 }
 0x220   : > { %929 = vst [vmem:[%s1533_s29 + $0x78] sm:$0xff] %v1162_v32  ;;  %v870_v33 = vpop.f32.mrb[15].mxu1 }
 0x221   : > { %927 = vst [vmem:[%s1533_s29 + $0x68] sm:$0xff] %v870_v33 }
 0x222 PF: > { %s18_s24 = sadd.s32 1, %s1282_s24  }
 0x223   : > { %p15_p4 = scmp.ge.s32.totalorder %s18_s24, 4  }
 0x225   :  { %17 = sbr.rel (!%p15_p4) target bundleno = 1 (0x1), region = 97 }

</bundles_post_ra>
